<compile_context>
chip_gen: v7x
topology: tpu7x:2x2x1
jax: 0.10.0
libtpu: 0.0.40
codegen_flags: <defaults>
</compile_context>

<pallas_src>
import jax
import jax.numpy as jnp
from jax.experimental import pallas as pl
from jax.experimental.pallas import tpu as pltpu


_LANE = 128
_MIB = 1024 * 1024
_TARGET_BLOCK_BYTES = 8 * _MIB        # ~8 MiB per x block (in+out double-buffered ~32 MiB)
_VMEM_LIMIT_SMALL = 48 * _MIB         # safe cap for v7x (64 MiB physical) / unknown
_VMEM_LIMIT_LARGE = 96 * _MIB         # v5e / v6e (128 MiB physical)
_THETA_ROW_CAP = 1024                 # cap on per-channel theta column rows


def _sst_scalar_theta_kernel(theta_ref, x_ref, o_ref):
    # theta_ref: (1, 1) float32 in SMEM;  x_ref / o_ref: (row_tile, lane_tile) in VMEM.
    x = x_ref[...]
    t = jnp.maximum(theta_ref[0, 0], jnp.float32(0.0)).astype(x.dtype)
    # sign(x) * relu(|x| - t)  ==  x - clip(x, -t, t)   (exact for t >= 0)
    o_ref[...] = x - jnp.clip(x, -t, t)


def _sst_rowwise_theta_kernel(x_ref, theta_ref, o_ref):
    # x_ref / o_ref: (row_tile, lane_tile);  theta_ref: (row_tile, 1) float32 per-row theta.
    x = x_ref[...]
    t = jnp.maximum(theta_ref[...], 0.0).astype(x.dtype)   # broadcasts over lanes
    o_ref[...] = x - jnp.clip(x, -t, t)


def _chip_budgets():
    """(target_block_bytes, vmem_limit_bytes) chosen from the local chip's VMEM size."""
    vmem_phys = None
    try:
        info = pltpu.get_tpu_info()
        for name in ("vmem_capacity_bytes", "vmem_size_bytes", "vmem_bytes"):
            v = getattr(info, name, None)
            if isinstance(v, int) and v > 0:
                vmem_phys = v
                break
    except Exception:
        vmem_phys = None
    if vmem_phys is not None and vmem_phys >= 96 * _MIB:
        return _TARGET_BLOCK_BYTES, _VMEM_LIMIT_LARGE      # v5e / v6e: 128 MiB VMEM
    return _TARGET_BLOCK_BYTES, _VMEM_LIMIT_SMALL           # v7x (64 MiB) or unknown


def _pick_tiles(R, L, itemsize, sub_align, target_bytes, cap_rows=None):
    """Choose (row_tile, lane_tile) targeting ~target_bytes per x block.

    Block shapes always satisfy the TPU constraint: each of the last two dims is
    either a multiple of (sub_align, 128) or equal to the full array extent.
    """
    # ---- lane tile ----
    if L <= _LANE or (L % _LANE != 0 and L <= 4 * _LANE):
        # Small or small-and-unaligned lane extent: take the full dim (legal),
        # avoids tiny ragged tail blocks.
        lane_tile = L
    else:
        max_lane = max(_LANE, target_bytes // (itemsize * sub_align))
        lane_tile = min((L // _LANE) * _LANE, (max_lane // _LANE) * _LANE)
        lane_tile = max(lane_tile, _LANE)
        if L % _LANE == 0 and lane_tile >= L:
            lane_tile = L

    # ---- row tile ----
    if R <= sub_align:
        row_tile = R
    else:
        rows_target = max(sub_align, target_bytes // (itemsize * lane_tile))
        rows_half = max(sub_align, (R // 2 // sub_align) * sub_align)
        row_tile = min((rows_target // sub_align) * sub_align, rows_half)
        if cap_rows is not None:
            row_tile = min(row_tile, cap_rows)
        row_tile = max(row_tile, sub_align)

    # ---- megacore guard: avoid a (1,1) grid for non-trivial slabs (v7x: 2 TCs) ----
    if (pl.cdiv(R, row_tile) == 1 and pl.cdiv(L, lane_tile) == 1
            and R * L * itemsize >= 2 * _MIB and lane_tile >= 2 * _LANE
            and lane_tile % _LANE == 0):
        lane_tile = max(_LANE, ((lane_tile // 2) // _LANE) * _LANE)

    return row_tile, lane_tile


def sst_forward(x, theta, *, donate_x=False):
    """SST forward: sign(x) * relu(|x| - clamp(theta, min=0)).

    x: (N, C, H, W) floating-point; theta: (1, P, 1, 1) with P == 1 or P == C.
    """
    assert jnp.issubdtype(x.dtype, jnp.floating), "SST expects a floating-point input"
    N, C, H, W = x.shape
    P = theta.shape[1]
    assert P in (1, C), "num_parameters must be 1 or C"

    itemsize = jnp.dtype(x.dtype).itemsize
    sub_align = {4: 8, 2: 16, 1: 32}.get(itemsize, 8)
    target_bytes, vmem_limit = _chip_budgets()

    compiler_params = pltpu.CompilerParams(
        dimension_semantics=("parallel", "parallel"),
        vmem_limit_bytes=vmem_limit,
    )
    cost = pl.CostEstimate(
        flops=5 * x.size,
        transcendentals=0,
        bytes_accessed=2 * x.size * itemsize,
    )

    R, L = N * C, H * W
    total = x.size

    if P == 1:
        # Scalar theta lives in SMEM (float32) -> no per-step theta DMA.
        # Lane-dense re-tiling: theta is uniform, so the (N*C, H*W) row structure is
        # irrelevant; if H*W is not 128-aligned but the total is, flatten to a
        # (rows, 128*k) slab so every store is an unmasked full-lane vst.
        if L % _LANE != 0 and total % _LANE == 0:
            lane_w = _LANE
            for cand in (1024, 512, 256, _LANE):
                if total % cand == 0:
                    lane_w = cand
                    break
            rows = total // lane_w
            x2d = x.reshape(rows, lane_w)
        else:
            rows, lane_w = R, L
            x2d = x.reshape(R, L)

        row_tile, lane_tile = _pick_tiles(rows, lane_w, itemsize, sub_align, target_bytes)
        grid = (pl.cdiv(rows, row_tile), pl.cdiv(lane_w, lane_tile))
        theta_s = theta.reshape(1, 1).astype(jnp.float32)

        extra = {"input_output_aliases": {1: 0}} if donate_x else {}
        out2d = pl.pallas_call(
            _sst_scalar_theta_kernel,
            out_shape=jax.ShapeDtypeStruct((rows, lane_w), x.dtype),
            grid=grid,
            in_specs=[
                pl.BlockSpec(memory_space=pltpu.MemorySpace.SMEM),
                pl.BlockSpec((row_tile, lane_tile), lambda i, j: (i, j)),
            ],
            out_specs=pl.BlockSpec((row_tile, lane_tile), lambda i, j: (i, j)),
            compiler_params=compiler_params,
            cost_estimate=cost,
            **extra,
        )(theta_s, x2d)
    else:
        # Per-channel theta: one threshold per (n, c) row of the slab, kept in float32.
        # Cap row_tile so the lane-padded (row_tile, 128) theta VMEM tile stays small.
        x2d = x.reshape(R, L)
        row_tile, lane_tile = _pick_tiles(
            R, L, itemsize, sub_align, target_bytes, cap_rows=_THETA_ROW_CAP)
        grid = (pl.cdiv(R, row_tile), pl.cdiv(L, lane_tile))
        theta_rows = jnp.broadcast_to(
            theta.reshape(1, C).astype(jnp.float32), (N, C)).reshape(R, 1)

        extra = {"input_output_aliases": {0: 0}} if donate_x else {}
        out2d = pl.pallas_call(
            _sst_rowwise_theta_kernel,
            out_shape=jax.ShapeDtypeStruct((R, L), x.dtype),
            grid=grid,
            in_specs=[
                pl.BlockSpec((row_tile, lane_tile), lambda i, j: (i, j)),
                pl.BlockSpec((row_tile, 1), lambda i, j: (i, 0)),
            ],
            out_specs=pl.BlockSpec((row_tile, lane_tile), lambda i, j: (i, j)),
            compiler_params=compiler_params,
            cost_estimate=cost,
            **extra,
        )(x2d, theta_rows)

    return out2d.reshape(N, C, H, W)


def _reference(x, theta):
    return jnp.sign(x) * jnp.maximum(jnp.abs(x) - jnp.maximum(theta, 0.0), 0.0)


if __name__ == "__main__":
    key = jax.random.PRNGKey(0)

    # --- P == 1 (scalar theta), 128-aligned spatial dims ---
    theta = jnp.full((1, 1, 1, 1), 0.01, dtype=jnp.float32)
    x = jax.random.normal(key, (2, 4, 16, 16), dtype=jnp.float32)
    out = jax.block_until_ready(sst_forward(x, theta))
    ref = _reference(x, theta)
    assert out.shape == x.shape and out.dtype == x.dtype
    assert jnp.allclose(out, ref, atol=1e-6), "mismatch vs reference (scalar theta)"

    # --- P == C (per-channel theta) ---
    theta_c = jnp.linspace(0.0, 0.05, 4, dtype=jnp.float32).reshape(1, 4, 1, 1)
    out_c = jax.block_until_ready(sst_forward(x, theta_c))
    ref_c = _reference(x, theta_c)
    assert jnp.allclose(out_c, ref_c, atol=1e-6), "mismatch vs reference (per-channel)"

    # --- P == 1 with non-128-aligned H*W (14x14): exercises the flat lane-dense path ---
    key2 = jax.random.PRNGKey(1)
    x2 = jax.random.normal(key2, (2, 16, 14, 14), dtype=jnp.float32)
    out2 = jax.block_until_ready(sst_forward(x2, theta))
    ref2 = _reference(x2, theta)
    assert jnp.allclose(out2, ref2, atol=1e-6), "mismatch vs reference (flat path)"

    print("KERNEL_OK")
</pallas_src>

<mosaic_0001>
module attributes {stable_mosaic.version = 11 : i64} {
  func.func @_sst_scalar_theta_kernel(%arg0: i32, %arg1: i32, %arg2: memref<1x1xf32, #tpu.memory_space<smem>>, %arg3: memref<8x256xf32, #tpu.memory_space<vmem>>, %arg4: memref<8x256xf32, #tpu.memory_space<vmem>>) attributes {dimension_semantics = [#tpu.dimension_semantics<parallel>, #tpu.dimension_semantics<parallel>], iteration_bounds = array<i64: 1, 1>, scalar_prefetch = 0 : i64, scratch_operands = 0 : i64, tpu.core_type = #tpu.core_type<tc>, window_params = [{transform_indices = @transform_0, window_bounds = array<i64: 1, 1>}, {transform_indices = @transform_1, window_bounds = array<i64: 8, 256>}, {transform_indices = @transform_2, window_bounds = array<i64: 8, 256>}]} {
    %c0 = arith.constant 0 : index
    %c0_0 = arith.constant 0 : index
    %0 = vector.load %arg3[%c0, %c0_0] : memref<8x256xf32, #tpu.memory_space<vmem>>, vector<8x256xf32>
    %c0_1 = arith.constant 0 : index
    %c0_2 = arith.constant 0 : index
    %1 = memref.load %arg2[%c0_1, %c0_2] : memref<1x1xf32, #tpu.memory_space<smem>>
    %cst = arith.constant 0.000000e+00 : f32
    %2 = arith.maximumf %1, %cst : f32
    %cst_3 = arith.constant 0.000000e+00 : f32
    %3 = arith.subf %cst_3, %2 : f32
    %4 = vector.broadcast %3 : f32 to vector<8x256xf32>
    %5 = arith.maximumf %4, %0 : vector<8x256xf32>
    %6 = vector.broadcast %2 : f32 to vector<8x256xf32>
    %7 = arith.minimumf %6, %5 : vector<8x256xf32>
    %8 = arith.subf %0, %7 : vector<8x256xf32>
    %c0_4 = arith.constant 0 : index
    %c0_5 = arith.constant 0 : index
    %9 = vector.load %arg4[%c0_4, %c0_5] : memref<8x256xf32, #tpu.memory_space<vmem>>, vector<8x256xf32>
    tpu.vector_store %arg4[%c0_4, %c0_5], %8 {strides = array<i32>} : memref<8x256xf32, #tpu.memory_space<vmem>>, vector<8x256xf32>,
    return
  }
  func.func @transform_0(%arg0: i32, %arg1: i32) -> (i32, i32) {
    %c0_i32 = arith.constant 0 : i32
    %c0_i32_0 = arith.constant 0 : i32
    %c0_i32_1 = arith.constant 0 : i32
    return %c0_i32, %c0_i32_0 : i32, i32
  }
  func.func @transform_1(%arg0: i32, %arg1: i32) -> (i32, i32) {
    %c0_i32 = arith.constant 0 : i32
    return %arg0, %arg1 : i32, i32
  }
  func.func @transform_2(%arg0: i32, %arg1: i32) -> (i32, i32) {
    %c0_i32 = arith.constant 0 : i32
    return %arg0, %arg1 : i32, i32
  }
}

</mosaic_0001>

<bundles_post_ra>
// kernel: tpu_custom_call.1
= control target key start
LH: loop header
LB: loop body
LE: loop exit
PB: predicated region body
PF: predicated region fallthrough
CT: control target
= control target key end

     0   :  { %8 = vsyncpa [#allocation4], 0  ;;  %s151_s0 = inlined_call_operand.<no memory space> [shape: f32[1,1], index: 0, kind: input, shape index: {}]   ;;  %s152_s1 = inlined_call_operand.hbm [shape: f32[8,256], index: 1, kind: input, shape index: {}]   ;;  %s153_s2 = inlined_call_operand.hbm [shape: f32[8,256], index: 2, kind: output, shape index: {}]  }
   0x1   :  { %9 = vsyncpa [#allocation5], 0  ;;  %s106_s9 = smov [#allocation3]   ;;  %s58_s13 = scalar_lea.hbm %s152_s1, 256 }
   0x2   :  { %s18_s10 = sshll.u32 %s106_s9, 4  ;;  %p59_p0 = scmp.ne.s32.totalorder %s152_s1, %s58_s13  ;;  %s19_s10 = int_to_ptr.vmem [resolvable:$true] %s18_s10 }
   0x3   :  { %p62_p1 = scmp.lt.u32.totalorder %s58_s13, %s152_s1 }
   0x5   :  { %p64_p2 = pnand %p62_p1, %p59_p0 }
   0x7   :  { %67 = shalt.err (!%p64_p2)
}
   0x8   :  { %s68_s18 = scalar_lea.vmem %s19_s10, 256  ;;  %p73_p4 = scmp.lt.s32.totalorder %s19_s10, %s19_s10 }
   0x9   :  { %p69_p3 = scmp.ne.s32.totalorder %s19_s10, %s68_s18  ;;  %p74_p5 = scmp.lt.s32.totalorder %s68_s18, %s68_s18 }
   0xb   :  { %p75_p6 = por %p74_p5, %p73_p4 }
   0xd   :  { %p76_p7 = pnand %p75_p6, %p69_p3 }
   0xf   :  { %79 = shalt.err (!%p76_p7)
}
  0x10   :  { %21 = dma.hbm_to_vmem [thread:$0]  %s152_s1, 256, %s19_s10, [#allocation4]  }
  0x11   :  { %102 = dma.done.wait [#allocation4], 256  }
  0x12   :  { %103 = vsyncadd [#allocation4], 4294967040  ;;  %s107_s21 = smov 0.0   ;;  %v25_v1 = vld [vmem:[#allocation3] sm:$0xff]  ;;  %v26_v3 = vld [vmem:[#allocation3 + $0x8] sm:$0xff]  ;;  %s108_s26 = smov [#allocation6]  }
  0x13   :  { %s28_s24 = smax.f32 %s107_s21, %s151_s0  ;;  %s46_s27 = sshll.u32 %s108_s26, 4  ;;  %s47_s27 = int_to_ptr.vmem [resolvable:$true] %s46_s27 }
  0x14   :  { %s29_s25 = ssub.f32 0.0, %s28_s24  ;;  %v33_v2 = vstv %s28_s24  ;;  %s80_s1 = scalar_lea.vmem %s47_s27, 256 }
  0x15   :  { %p81_p8 = scmp.ne.s32.totalorder %s47_s27, %s80_s1  ;;  %p85_p9 = scmp.lt.s32.totalorder %s47_s27, %s47_s27 }
  0x16   :  { %v30_v0 = vstv %s29_s25  ;;  %p86_p10 = scmp.lt.s32.totalorder %s80_s1, %s80_s1 }
  0x17   :  { %v31_v4 = vmax.f32 %v30_v0, %v25_v1  ;;  %v32_v5 = vmax.f32 %v30_v0, %v26_v3 }
  0x18   :  { %p87_p11 = por %p86_p10, %p85_p9 }
  0x19   :  { %v34_v6 = vmin.f32 %v33_v2, %v31_v4  ;;  %v35_v7 = vmin.f32 %v33_v2, %v32_v5 }
  0x1a   :  { %p88_p12 = pnand %p87_p11, %p81_p8 }
  0x1b   :  { %v36_v8 = vsub.f32 %v25_v1, %v34_v6  ;;  %v37_v9 = vsub.f32 %v26_v3, %v35_v7 }
  0x1d   :  { %38 = vst [vmem:[#allocation6] sm:$0xff] %v36_v8  ;;  %39 = vst [vmem:[#allocation6 + $0x8] sm:$0xff] %v37_v9 }
  0x1e   :  { %91 = shalt.err (!%p88_p12)
}
  0x1f   :  { %s92_s29 = scalar_lea.hbm %s153_s2, 256 }
  0x20   :  { %p93_p13 = scmp.ne.s32.totalorder %s153_s2, %s92_s29  ;;  %p96_p0 = scmp.lt.u32.totalorder %s92_s29, %s153_s2 }
  0x22   :  { %p98_p1 = pnand %p96_p0, %p93_p13 }
  0x24   :  { %101 = shalt.err (!%p98_p1)
}
  0x25   :  { %49 = dma.vmem_to_hbm [thread:$0]  %s47_s27, 256, %s153_s2, [#allocation5]  }
  0x26   :  { %104 = dma.done.wait [#allocation5], 256  }
  0x27   :  { %105 = vsyncadd [#allocation5], 4294967040 }
  0x28   :  { %53 = vsyncpa [#allocation4], 1 }
  0x29   :  { %54 = vsyncpa [#allocation5], 1 }

</bundles_post_ra>
